<compile_context>
chip_gen: v6e
topology: v6e:2x2x1
jax: 0.10.0
libtpu: 0.0.40
codegen_flags: <defaults>
</compile_context>

<pallas_src>
import functools

import jax
import jax.numpy as jnp
from jax.experimental import pallas as pl
from jax.experimental.pallas import tpu as pltpu


def _round_up(x, m):
    return (x + m - 1) // m * m


def _cdiv(a, b):
    return (a + b - 1) // b


def _vmem_capacity_bytes():
    """Per-core VMEM capacity; falls back to a v7x-safe 64 MiB."""
    try:
        cap = int(pltpu.get_tpu_info().vmem_capacity_bytes)
        return max(cap, 16 << 20)
    except Exception:
        return 64 << 20


def _patch_proj_kernel(x_ref, w_ref, b_ref, o_ref):
    # x_ref: (tm, K), w_ref: (K, tn), b_ref: (1, tn) f32, o_ref: (tm, tn)
    acc = jnp.dot(x_ref[...], w_ref[...], preferred_element_type=jnp.float32)
    o_ref[...] = (acc + b_ref[...]).astype(o_ref.dtype)


def _choose_tiles(M, K, Np, in_isz, out_isz, budget_bytes):
    """Pick (tm, tn, per_step_vmem_bytes) against a double-buffered budget."""

    def step_bytes(tm, tn):
        return (2 * tm * K * in_isz       # patches tile, double-buffered
                + 2 * K * tn * in_isz     # weight tile, double-buffered
                + 2 * tm * tn * out_isz   # output tile, double-buffered
                + 2 * tn * 4              # f32 bias tile
                + tm * tn * 4)            # f32 dot-result / cast intermediate

    # tn: keep the whole (padded) embed dim resident while the double-buffered
    # weight block stays under ~1/3 of the budget; otherwise shrink to a
    # 128-multiple divisor of Np.
    tn_cands = [t for t in (Np, 2048, 1536, 1024, 768, 512, 384, 256, 128)
                if t <= Np and Np % t == 0]
    tn = tn_cands[-1]
    for t in tn_cands:
        if 2 * K * t * in_isz <= budget_bytes // 3:
            tn = t
            break

    m8 = _round_up(M, 8)
    if m8 <= 256:
        tm = m8
        while tm > 8 and step_bytes(tm, tn) > budget_bytes:
            tm = max(8, _round_up(tm // 2, 8))
        return tm, tn, step_bytes(tm, tn)

    tm_cands = [t for t in (2048, 1792, 1536, 1280, 1024, 896, 768, 640,
                            512, 448, 384, 320, 256) if t <= m8]
    if not tm_cands:
        tm_cands = [256]
    feasible = [t for t in tm_cands if step_bytes(t, tn) <= budget_bytes]
    if not feasible:
        # Huge K: shrink the N tile first so the LHS can stay >= 256 rows tall
        # (an 8-row LHS wastes ~97% of each 256-tall MXU pass).
        tn = 128
        feasible = [t for t in tm_cands if step_bytes(t, tn) <= budget_bytes]
    if not feasible:
        tm = 256
        while tm > 8 and step_bytes(tm, tn) > budget_bytes:
            tm = max(8, _round_up(tm // 2, 8))
        return tm, tn, step_bytes(tm, tn)

    def waste_frac(tm):
        padded = _cdiv(M, tm) * tm
        return (padded - M) / padded

    # With a single N-step, keep >= 2 M-steps so both v7x TensorCores get work
    # (both grid axes are marked "parallel").
    if Np // tn == 1:
        multi = [t for t in feasible if _cdiv(M, t) >= 2]
        if multi:
            feasible = multi

    good = [t for t in feasible if waste_frac(t) <= 0.125]
    if good:
        tm = max(good)                       # big tiles amortize per-step cost
    else:
        tm = min(feasible, key=lambda t: (waste_frac(t), -t))
    return tm, tn, step_bytes(tm, tn)


def patch_embed_forward(x, weight, bias, patch_size, *,
                        compute_dtype=jnp.bfloat16, out_dtype=None,
                        fuse_patch_input=True):
    """PatchEmbed.forward (flatten=True, norm=Identity).

    Args:
      x:      (B, C, H, W)   NCHW image batch, like the PyTorch module.
      weight: (E, C, ph, pw) Conv2d weight.
      bias:   (E,)           Conv2d bias.
      patch_size: (ph, pw).
      compute_dtype: dtype of the MXU operands (default bf16, MXU-native on
        all TPU generations); accumulation and the bias add stay f32.
      out_dtype: output dtype (default: x.dtype). Pass jnp.bfloat16 when the
        downstream layer accepts it — it halves the dominant HBM write.
      fuse_patch_input: allow XLA to fuse the NCHW->patch rearrange into the
        kernel's input DMA (allow_input_fusion).

    Returns:
      (B, num_patches, E) in out_dtype.
    """
    B, C, H, W = x.shape
    ph, pw = patch_size
    E = weight.shape[0]
    assert H % ph == 0 and W % pw == 0, "image size must divide by patch size"
    gh, gw = H // ph, W // pw
    num_patches = gh * gw

    out_dtype = jnp.dtype(x.dtype if out_dtype is None else out_dtype)
    cd = jnp.dtype(compute_dtype) if compute_dtype is not None else jnp.dtype(x.dtype)

    # Non-overlapping patch extraction. With allow_input_fusion below, this
    # reshape/transpose/convert chain feeds the kernel's input DMA directly
    # (no separate HBM materialization of the (M, K) matrix).
    # K ordering stays (C, ph, pw): with NCHW input that keeps contiguous
    # pw-element source runs under the rearrange.
    # TODO(synk): for NHWC input pipelines switch to (ph, pw, C) K ordering
    # (and permute w_mat rows) so the rearrange streams pw*C-contiguous chunks.
    patches = x.reshape(B, C, gh, ph, gw, pw)
    patches = patches.transpose(0, 2, 4, 1, 3, 5)
    patches = patches.reshape(B * num_patches, C * ph * pw).astype(cd)

    # Conv weight (E, C, ph, pw) -> GEMM weight (K, E); bias stays f32.
    w_mat = weight.reshape(E, C * ph * pw).T.astype(cd)
    b_mat = bias.astype(jnp.float32).reshape(1, E)

    M, K = patches.shape
    N = E

    # Pad only the (tiny) weight/bias N dim to a lane-dense multiple of 128 so
    # output stores are unmasked; the big patch matrix is never padded.
    Np = _round_up(N, 128)
    if Np != N:
        w_mat = jnp.pad(w_mat, ((0, 0), (0, Np - N)))
        b_mat = jnp.pad(b_mat, ((0, 0), (0, Np - N)))

    in_isz = cd.itemsize
    out_isz = out_dtype.itemsize
    capacity = _vmem_capacity_bytes()
    budget = max(12 << 20, capacity // 3)          # ~21 MB v7x, ~42 MB v5e/v6e
    tm, tn, tile_bytes = _choose_tiles(M, K, Np, in_isz, out_isz, budget)

    # Ragged M tail handled by a masked boundary block (no jnp.pad HBM pass).
    grid = (pl.cdiv(M, tm), Np // tn)

    vmem_limit = int(min(capacity - (8 << 20), max(32 << 20, 2 * tile_bytes)))

    cost = pl.CostEstimate(
        flops=2 * M * K * Np,
        transcendentals=0,
        bytes_accessed=(M * K * in_isz + K * Np * in_isz
                        + M * Np * out_isz + Np * 4),
    )

    # TODO(synk): when grid[1] == 1 the weight/bias block index is
    # grid-invariant; pipeline_mode=pl.Buffered(1) would halve their VMEM
    # footprint (most useful on v7x's 64 MiB) — left at default double
    # buffering for portability.
    out = pl.pallas_call(
        _patch_proj_kernel,
        out_shape=jax.ShapeDtypeStruct((M, Np), out_dtype),
        grid_spec=pltpu.PrefetchScalarGridSpec(
            num_scalar_prefetch=0,
            grid=grid,
            in_specs=[
                # patches tile: constant across the inner N axis -> one DMA per i
                pl.BlockSpec((tm, K), lambda i, j: (i, 0)),
                # weight / bias: constant across the M axis
                pl.BlockSpec((K, tn), lambda i, j: (0, j)),
                pl.BlockSpec((1, tn), lambda i, j: (0, j)),
            ],
            out_specs=pl.BlockSpec((tm, tn), lambda i, j: (i, j)),
        ),
        compiler_params=pltpu.CompilerParams(
            dimension_semantics=("parallel", "parallel"),
            vmem_limit_bytes=vmem_limit,
            allow_input_fusion=([True, False, False] if fuse_patch_input else None),
        ),
        cost_estimate=cost,
    )(patches, w_mat, b_mat)

    if Np != N:
        out = out[:, :N]
    return out.reshape(B, num_patches, N)


if __name__ == "__main__":
    # Small shapes consistent with the module: img 16x16, patch 4x4, 4 input
    # channels, 32 embed dim.
    B, C, H, W = 2, 4, 16, 16
    patch_size = (4, 4)
    embed_dim = 32

    key = jax.random.PRNGKey(0)
    kx, kw, kb = jax.random.split(key, 3)

    x = jax.random.normal(kx, (B, C, H, W), dtype=jnp.float32)
    # Param init matching nn.Conv2d(in_chans, embed_dim, patch, stride=patch) shapes.
    fan_in = C * patch_size[0] * patch_size[1]
    bound = 1.0 / (fan_in ** 0.5)
    weight = jax.random.uniform(kw, (embed_dim, C, patch_size[0], patch_size[1]),
                                minval=-bound, maxval=bound, dtype=jnp.float32)
    bias = jax.random.uniform(kb, (embed_dim,), minval=-bound, maxval=bound,
                              dtype=jnp.float32)

    # Reference: Conv2d(stride=patch) + flatten(2).transpose(1, 2).
    ref = jax.lax.conv_general_dilated(
        x, weight, window_strides=patch_size, padding="VALID",
        dimension_numbers=("NCHW", "OIHW", "NCHW")) + bias[None, :, None, None]
    ref = ref.reshape(B, embed_dim, -1).transpose(0, 2, 1)
    num_patches = (H // patch_size[0]) * (W // patch_size[1])

    # Default path: bf16 MXU operands, f32 accumulate/epilogue, f32 output.
    fwd = jax.jit(functools.partial(patch_embed_forward, patch_size=patch_size))
    out = jax.block_until_ready(fwd(x, weight, bias))
    assert out.shape == (B, num_patches, embed_dim)
    assert out.dtype == x.dtype
    assert jnp.allclose(out, ref, atol=5e-2, rtol=5e-2)

    # f32 MXU operands: tight numerical check against the conv reference.
    fwd_f32 = jax.jit(functools.partial(patch_embed_forward, patch_size=patch_size,
                                        compute_dtype=jnp.float32))
    out_f32 = jax.block_until_ready(fwd_f32(x, weight, bias))
    assert jnp.allclose(out_f32, ref, atol=1e-4, rtol=1e-4)

    # bf16 output path (for downstream layers that accept bf16 activations).
    fwd_bf16_out = jax.jit(functools.partial(patch_embed_forward,
                                             patch_size=patch_size,
                                             out_dtype=jnp.bfloat16))
    out_bf16 = jax.block_until_ready(fwd_bf16_out(x, weight, bias))
    assert out_bf16.shape == (B, num_patches, embed_dim)
    assert out_bf16.dtype == jnp.bfloat16
    assert jnp.allclose(out_bf16.astype(jnp.float32), ref, atol=5e-2, rtol=5e-2)

    print("KERNEL_OK")
</pallas_src>

<mosaic_0001>
module attributes {stable_mosaic.version = 11 : i64} {
  func.func @_patch_proj_kernel(%arg0: i32, %arg1: i32, %arg2: memref<32x64xbf16, #tpu.memory_space<vmem>>, %arg3: memref<64x128xbf16, #tpu.memory_space<vmem>>, %arg4: memref<1x128xf32, #tpu.memory_space<vmem>>, %arg5: memref<32x128xf32, #tpu.memory_space<vmem>>) attributes {dimension_semantics = [#tpu.dimension_semantics<parallel>, #tpu.dimension_semantics<parallel>], iteration_bounds = array<i64: 1, 1>, scalar_prefetch = 0 : i64, scratch_operands = 0 : i64, tpu.core_type = #tpu.core_type<tc>, window_params = [{transform_indices = @transform_0, window_bounds = array<i64: 32, 64>}, {transform_indices = @transform_1, window_bounds = array<i64: 64, 128>}, {transform_indices = @transform_2, window_bounds = array<i64: 1, 128>}, {transform_indices = @transform_3, window_bounds = array<i64: 32, 128>}]} {
    %c0 = arith.constant 0 : index
    %c0_0 = arith.constant 0 : index
    %0 = vector.load %arg2[%c0, %c0_0] : memref<32x64xbf16, #tpu.memory_space<vmem>>, vector<32x64xbf16>
    %c0_1 = arith.constant 0 : index
    %c0_2 = arith.constant 0 : index
    %1 = vector.load %arg3[%c0_1, %c0_2] : memref<64x128xbf16, #tpu.memory_space<vmem>>, vector<64x128xbf16>
    %cst = arith.constant dense<0.000000e+00> : vector<32x128xf32>
    %2 = tpu.matmul %0, %1, %cst {dimension_numbers = #tpu.dot_dimension_numbers<[1], [0], [0], [1], [0, 0, 1, 1], [], []>} : vector<32x64xbf16>, vector<64x128xbf16>, vector<32x128xf32> -> vector<32x128xf32>
    %c0_3 = arith.constant 0 : index
    %c0_4 = arith.constant 0 : index
    %3 = vector.load %arg4[%c0_3, %c0_4] : memref<1x128xf32, #tpu.memory_space<vmem>>, vector<1x128xf32>
    %4 = vector.broadcast %3 : vector<1x128xf32> to vector<32x128xf32>
    %5 = arith.addf %2, %4 : vector<32x128xf32>
    %c0_5 = arith.constant 0 : index
    %c0_6 = arith.constant 0 : index
    %6 = vector.load %arg5[%c0_5, %c0_6] : memref<32x128xf32, #tpu.memory_space<vmem>>, vector<32x128xf32>
    tpu.vector_store %arg5[%c0_5, %c0_6], %5 {strides = array<i32>} : memref<32x128xf32, #tpu.memory_space<vmem>>, vector<32x128xf32>,
    return
  }
  func.func @transform_0(%arg0: i32, %arg1: i32) -> (i32, i32) {
    %c0_i32 = arith.constant 0 : i32
    %c0_i32_0 = arith.constant 0 : i32
    return %arg0, %c0_i32 : i32, i32
  }
  func.func @transform_1(%arg0: i32, %arg1: i32) -> (i32, i32) {
    %c0_i32 = arith.constant 0 : i32
    %c0_i32_0 = arith.constant 0 : i32
    return %c0_i32, %arg1 : i32, i32
  }
  func.func @transform_2(%arg0: i32, %arg1: i32) -> (i32, i32) {
    %c0_i32 = arith.constant 0 : i32
    %c0_i32_0 = arith.constant 0 : i32
    return %c0_i32, %arg1 : i32, i32
  }
  func.func @transform_3(%arg0: i32, %arg1: i32) -> (i32, i32) {
    %c0_i32 = arith.constant 0 : i32
    return %arg0, %arg1 : i32, i32
  }
}

</mosaic_0001>

<bundles_post_ra>
// kernel: patch_embed_forward.1
= control target key start
LH: loop header
LB: loop body
LE: loop exit
PB: predicated region body
PF: predicated region fallthrough
CT: control target
= control target key end

     0   :  { %vm69_vm0 = vcmask 523264   ;;  %s250_s0 = inlined_call_operand.vmem [shape: bf16[32,64], index: 0, kind: input, shape index: {}]   ;;  %s251_s1 = inlined_call_operand.vmem [shape: bf16[64,128], index: 1, kind: input, shape index: {}]   ;;  %s252_s2 = inlined_call_operand.vmem [shape: f32[1,128], index: 2, kind: input, shape index: {}]   ;;  %s253_s3 = inlined_call_operand.hbm [shape: f32[32,128], index: 3, kind: output, shape index: {}]  }
   0x1   :  { %v175_v0 = vld [vmem:[%s251_s1 + $0x18] sm:$0xff]   ;;  %v176_v1 = vld [vmem:[%s251_s1 + $0x10] sm:$0xff]   ;;  %v177_v2 = vld [vmem:[%s251_s1 + $0x8] sm:$0xff]  }
   0x2   :  { %160 = vmatprep.subr.bf16.mxu0 %v175_v0  ;;  %v179_v3 = vld [vmem:[%s250_s0] sm:$0xff]  }
   0x3   :  { %161 = vmatpush3.bf16.msra.mxu0 %v175_v0  ;;  %168 = vmatprep.mubr.msk.bf16.mxu0 %vm69_vm0, %v179_v3 }
   0x4   :  { %162 = vmatprep.subr.bf16.mxu0 %v176_v1 }
   0x5   :  { %8 = vsyncpa [#allocation3], 0  ;;  %v178_v4 = vld [vmem:[%s251_s1] sm:$0xff]   ;;  %v180_v5 = vld [vmem:[%s250_s0 + $0x8] sm:$0xff]   ;;  %s203_s26 = smov [#allocation2]  }
   0x6   :  { %v145_v6 = vld [vmem:[%s252_s2] ss:$0 sm:$0xff]  ;;  %s134_s27 = sshll.u32 %s203_s26, 4  ;;  %s135_s27 = int_to_ptr.vmem [resolvable:$true] %s134_s27 }
   0x7   :  { %163 = vmatpush3.bf16.msra.mxu0 %v176_v1  ;;  %s181_s0 = scalar_lea.vmem %s135_s27, 512  ;;  %p186_p1 = scmp.lt.s32.totalorder %s135_s27, %s135_s27 }
   0x8   :  { %164 = vmatprep.subr.bf16.mxu0 %v177_v2  ;;  %p182_p0 = scmp.ne.s32.totalorder %s135_s27, %s181_s0  ;;  %p187_p2 = scmp.lt.s32.totalorder %s181_s0, %s181_s0 }
   0xa   :  { %p188_p3 = por %p187_p2, %p186_p1 }
   0xb   :  { %165 = vmatpush3.bf16.msra.mxu0 %v177_v2 }
   0xc   :  { %166 = vmatprep.subr.bf16.mxu0 %v178_v4  ;;  %p189_p4 = pnand %p188_p3, %p182_p0 }
   0xf   :  { %167 = vmatpush3.bf16.msra.mxu0 %v178_v4 }
  0x12   :  { %169 = vmatmul.mubr.msk.bf16.vlgmr.msra.gmra.mxu0 %vm69_vm0, %v180_v5 }
  0xd2   :  { %v170_v7 = vpop.f32.mrf.mxu0 }
  0xd3   :  { %v119_v8 = vadd.f32 %v170_v7, %v145_v6 }
  0xd4   :  { %v110_v9 = vpop.f32.mrf.mxu0 }
  0xd5   :  { %127 = vst [vmem:[#allocation2 + $0x10] sm:$0xff] %v119_v8  ;;  %v111_v10 = vadd.f32 %v145_v6, %v110_v9 }
  0xd6   :  { %v171_v11 = vpop.f32.mrf.mxu0 }
  0xd7   :  { %125 = vst [vmem:[#allocation2] sm:$0xff] %v111_v10  ;;  %v122_v12 = vadd.f32 %v171_v11, %v145_v6 }
  0xd8   :  { %v113_v13 = vpop.f32.mrf.mxu0 }
  0xd9   :  { %128 = vst [vmem:[#allocation2 + $0x18] sm:$0xff] %v122_v12  ;;  %v114_v14 = vadd.f32 %v145_v6, %v113_v13 }
  0xdb   :  { %126 = vst [vmem:[#allocation2 + $0x8] sm:$0xff] %v114_v14 }
  0xdc   :  { %192 = shalt.err (!%p189_p4)
}
  0xdd   :  { %s204_s1 = smov 128   ;;  %s205_s2 = smov 8  }
  0xde   :  { %140 = dma.vmem_to_hbm [thread:$0]  %s135_s27, 512, %s253_s3, [#allocation3], %s204_s1, %s204_s1, %s205_s2  }
  0xdf   :  { %201 = dma.done.wait [#allocation3], 512  }
  0xe0   :  { %202 = vsyncadd [#allocation3], 4294966784 }
  0xe1   :  { %144 = vsyncpa [#allocation3], 1 }

</bundles_post_ra>
